<compile_context>
chip_gen: v7x
topology: tpu7x:2x2x1
jax: 0.10.0
libtpu: 0.0.40
codegen_flags: <defaults>
</compile_context>

<pallas_src>
import jax
import jax.numpy as jnp
from jax.experimental import pallas as pl
from jax.experimental.pallas import tpu as pltpu

IN_F = 6        # Linear(6, 3) input features
HID = 3         # hidden units
OUT_F = 1       # Linear(3, 1) output

IN_PAD = 8      # features padded to one sublane group
HID_PAD = 8     # hidden padded to one sublane group
TB_MAX = 2048   # batch columns (lanes) per tile for the pipelined 1-D grid


def _mlp_kernel(xt_ref, w1t_ref, b1_ref, w2t_ref, b2_ref, o_ref):
    """Fused forward for one batch tile (batch on the lane axis).

    xt_ref : (IN_PAD,  tb)       features x batch-columns
    w1t_ref: (HID_PAD, IN_PAD)   W1^T zero-padded
    b1_ref : (HID_PAD, 1)
    w2t_ref: (HID_PAD, HID_PAD)  row 0 holds W2^T, rest zero
    b2_ref : (1, 1)
    o_ref  : (1, tb)             lane-dense probabilities
    """
    xt = xt_ref[...]                                                    # (8, tb)
    h = jnp.dot(w1t_ref[...], xt, preferred_element_type=jnp.float32)   # (8, tb)
    h = jax.nn.sigmoid(h + b1_ref[...])              # (8,1) lane-broadcast bias
    z = jnp.dot(w2t_ref[...], h, preferred_element_type=jnp.float32)    # (8, tb)
    # Row 0 is the only real logit row; sigmoid only what we store (lane-dense).
    o_ref[...] = jax.nn.sigmoid(z[:OUT_F, :] + b2_ref[...])             # (1, tb)


def mlp_forward(x, w1, b1, w2, b2):
    """sigmoid(sigmoid(x @ W1 + b1) @ W2 + b2).  x: [B, 6] f32 -> [B, 1] f32."""
    B = x.shape[0]
    assert x.shape[1] == IN_F

    tb = B if B <= TB_MAX else TB_MAX
    grid = (pl.cdiv(B, tb),)

    # Tiny constant-size parameter pads (done once; fused by XLA under jit).
    w1t = jnp.zeros((HID_PAD, IN_PAD), jnp.float32).at[:HID, :IN_F].set(w1.T)
    b1c = jnp.zeros((HID_PAD, 1), jnp.float32).at[:HID, 0].set(b1)
    w2t = jnp.zeros((HID_PAD, HID_PAD), jnp.float32).at[:OUT_F, :HID].set(w2.T)
    b2c = jnp.reshape(b2.astype(jnp.float32), (1, 1))

    # Present x feature-major so the batch rides the 128-wide lane axis.
    xt = jnp.zeros((IN_PAD, B), jnp.float32).at[:IN_F, :].set(x.T)

    out = pl.pallas_call(
        _mlp_kernel,
        out_shape=jax.ShapeDtypeStruct((1, B), jnp.float32),
        grid=grid,
        in_specs=[
            pl.BlockSpec((IN_PAD, tb), lambda i: (0, i)),        # x tiled over batch lanes
            pl.BlockSpec((HID_PAD, IN_PAD), lambda i: (0, 0)),   # params stay resident
            pl.BlockSpec((HID_PAD, 1), lambda i: (0, 0)),
            pl.BlockSpec((HID_PAD, HID_PAD), lambda i: (0, 0)),
            pl.BlockSpec((1, 1), lambda i: (0, 0)),
        ],
        out_specs=pl.BlockSpec((1, tb), lambda i: (0, i)),
        compiler_params=pltpu.CompilerParams(
            dimension_semantics=("parallel",),   # batch tiles independent -> megacore
        ),
    )(xt, w1t, b1c, w2t, b2c)
    return out.reshape(B, OUT_F)


def mlp_test(x, w1, b1, w2, b2):
    """Equivalent of Model.test(): threshold probabilities at 0.5 -> {0,1}."""
    probs = mlp_forward(x, w1, b1, w2, b2)          # [B, 1]
    return (probs[:, 0] > 0.5).astype(jnp.int32)    # [B]


def init_params(key):
    # Deterministic init mimicking nn.Linear's uniform(-1/sqrt(fan_in), ...)
    k1, k2, k3, k4 = jax.random.split(key, 4)
    lim1 = 1.0 / jnp.sqrt(IN_F)
    lim2 = 1.0 / jnp.sqrt(HID)
    w1 = jax.random.uniform(k1, (IN_F, HID), jnp.float32, -lim1, lim1)
    b1 = jax.random.uniform(k2, (HID,), jnp.float32, -lim1, lim1)
    w2 = jax.random.uniform(k3, (HID, OUT_F), jnp.float32, -lim2, lim2)
    b2 = jax.random.uniform(k4, (OUT_F,), jnp.float32, -lim2, lim2)
    return w1, b1, w2, b2


if __name__ == "__main__":
    key = jax.random.PRNGKey(0)
    pkey, xkey, x2key = jax.random.split(key, 3)
    w1, b1, w2, b2 = init_params(pkey)

    def ref_fwd(xx):
        return jax.nn.sigmoid(jax.nn.sigmoid(xx @ w1 + b1) @ w2 + b2)

    fwd = jax.jit(mlp_forward)

    # Small batch of 6-dim Titanic feature rows (single full-array tile).
    B = 8
    x = jax.random.normal(xkey, (B, IN_F), jnp.float32)
    probs = fwd(x, w1, b1, w2, b2)
    preds = mlp_test(x, w1, b1, w2, b2)
    jax.block_until_ready((probs, preds))
    assert probs.shape == (B, OUT_F)
    assert preds.shape == (B,)
    assert jnp.allclose(probs, ref_fwd(x), atol=1e-5), "mismatch vs reference (B=8)"

    # Larger batch exercising the pipelined 1-D grid (incl. partial last tile).
    B2 = 4104  # 2 full 2048-lane tiles + one 8-lane partial tile
    x2 = jax.random.normal(x2key, (B2, IN_F), jnp.float32)
    probs2 = fwd(x2, w1, b1, w2, b2)
    jax.block_until_ready(probs2)
    assert probs2.shape == (B2, OUT_F)
    assert jnp.allclose(probs2, ref_fwd(x2), atol=1e-5), "mismatch vs reference (B=4104)"

    print("KERNEL_OK")
</pallas_src>

<mosaic_0001>
module attributes {stable_mosaic.version = 11 : i64} {
  func.func @_mlp_kernel(%arg0: i32, %arg1: memref<8x8xf32, #tpu.memory_space<vmem>>, %arg2: memref<8x8xf32, #tpu.memory_space<vmem>>, %arg3: memref<8x1xf32, #tpu.memory_space<vmem>>, %arg4: memref<8x8xf32, #tpu.memory_space<vmem>>, %arg5: memref<1x1xf32, #tpu.memory_space<vmem>>, %arg6: memref<1x8xf32, #tpu.memory_space<vmem>>) attributes {dimension_semantics = [#tpu.dimension_semantics<parallel>], iteration_bounds = array<i64: 1>, scalar_prefetch = 0 : i64, scratch_operands = 0 : i64, tpu.core_type = #tpu.core_type<tc>, window_params = [{transform_indices = @transform_0, window_bounds = array<i64: 8, 8>}, {pipeline_mode = #tpu.pipeline_mode<synchronous>, transform_indices = @transform_1, window_bounds = array<i64: 8, 8>}, {pipeline_mode = #tpu.pipeline_mode<synchronous>, transform_indices = @transform_2, window_bounds = array<i64: 8, 1>}, {pipeline_mode = #tpu.pipeline_mode<synchronous>, transform_indices = @transform_3, window_bounds = array<i64: 8, 8>}, {pipeline_mode = #tpu.pipeline_mode<synchronous>, transform_indices = @transform_4, window_bounds = array<i64: 1, 1>}, {transform_indices = @transform_5, window_bounds = array<i64: 1, 8>}]} {
    %c0 = arith.constant 0 : index
    %c0_0 = arith.constant 0 : index
    %0 = vector.load %arg1[%c0, %c0_0] : memref<8x8xf32, #tpu.memory_space<vmem>>, vector<8x8xf32>
    %c0_1 = arith.constant 0 : index
    %c0_2 = arith.constant 0 : index
    %1 = vector.load %arg2[%c0_1, %c0_2] : memref<8x8xf32, #tpu.memory_space<vmem>>, vector<8x8xf32>
    %cst = arith.constant dense<0.000000e+00> : vector<8x8xf32>
    %2 = tpu.matmul %1, %0, %cst {dimension_numbers = #tpu.dot_dimension_numbers<[1], [0], [0], [1], [0, 0, 1, 1], [], []>} : vector<8x8xf32>, vector<8x8xf32>, vector<8x8xf32> -> vector<8x8xf32>
    %c0_3 = arith.constant 0 : index
    %c0_4 = arith.constant 0 : index
    %3 = vector.load %arg3[%c0_3, %c0_4] : memref<8x1xf32, #tpu.memory_space<vmem>>, vector<8x1xf32>
    %4 = vector.broadcast %3 : vector<8x1xf32> to vector<8x8xf32>
    %5 = arith.addf %2, %4 : vector<8x8xf32>
    %6 = arith.negf %5 : vector<8x8xf32>
    %7 = math.exp %6 : vector<8x8xf32>
    %cst_5 = arith.constant 1.000000e+00 : f32
    %8 = vector.broadcast %cst_5 : f32 to vector<8x8xf32>
    %9 = arith.addf %8, %7 : vector<8x8xf32>
    %10 = arith.divf %8, %9 : vector<8x8xf32>
    %c0_6 = arith.constant 0 : index
    %c0_7 = arith.constant 0 : index
    %11 = vector.load %arg4[%c0_6, %c0_7] : memref<8x8xf32, #tpu.memory_space<vmem>>, vector<8x8xf32>
    %cst_8 = arith.constant dense<0.000000e+00> : vector<8x8xf32>
    %12 = tpu.matmul %11, %10, %cst_8 {dimension_numbers = #tpu.dot_dimension_numbers<[1], [0], [0], [1], [0, 0, 1, 1], [], []>} : vector<8x8xf32>, vector<8x8xf32>, vector<8x8xf32> -> vector<8x8xf32>
    %13 = vector.extract_strided_slice %12 {offsets = [0, 0], sizes = [1, 8], strides = [1, 1]} : vector<8x8xf32> to vector<1x8xf32>
    %c0_9 = arith.constant 0 : index
    %c0_10 = arith.constant 0 : index
    %14 = vector.load %arg5[%c0_9, %c0_10] : memref<1x1xf32, #tpu.memory_space<vmem>>, vector<1x1xf32>
    %15 = vector.broadcast %14 : vector<1x1xf32> to vector<1x8xf32>
    %16 = arith.addf %13, %15 : vector<1x8xf32>
    %17 = arith.negf %16 : vector<1x8xf32>
    %18 = math.exp %17 : vector<1x8xf32>
    %cst_11 = arith.constant 1.000000e+00 : f32
    %19 = vector.broadcast %cst_11 : f32 to vector<1x8xf32>
    %20 = arith.addf %19, %18 : vector<1x8xf32>
    %21 = arith.divf %19, %20 : vector<1x8xf32>
    %c0_12 = arith.constant 0 : index
    %c0_13 = arith.constant 0 : index
    %22 = vector.load %arg6[%c0_12, %c0_13] : memref<1x8xf32, #tpu.memory_space<vmem>>, vector<1x8xf32>
    tpu.vector_store %arg6[%c0_12, %c0_13], %21 {strides = array<i32>} : memref<1x8xf32, #tpu.memory_space<vmem>>, vector<1x8xf32>,
    return
  }
  func.func @transform_0(%arg0: i32) -> (i32, i32) {
    %c0_i32 = arith.constant 0 : i32
    %c0_i32_0 = arith.constant 0 : i32
    return %c0_i32, %arg0 : i32, i32
  }
  func.func @transform_1(%arg0: i32) -> (i32, i32) {
    %c0_i32 = arith.constant 0 : i32
    %c0_i32_0 = arith.constant 0 : i32
    %c0_i32_1 = arith.constant 0 : i32
    return %c0_i32, %c0_i32_0 : i32, i32
  }
  func.func @transform_2(%arg0: i32) -> (i32, i32) {
    %c0_i32 = arith.constant 0 : i32
    %c0_i32_0 = arith.constant 0 : i32
    %c0_i32_1 = arith.constant 0 : i32
    return %c0_i32, %c0_i32_0 : i32, i32
  }
  func.func @transform_3(%arg0: i32) -> (i32, i32) {
    %c0_i32 = arith.constant 0 : i32
    %c0_i32_0 = arith.constant 0 : i32
    %c0_i32_1 = arith.constant 0 : i32
    return %c0_i32, %c0_i32_0 : i32, i32
  }
  func.func @transform_4(%arg0: i32) -> (i32, i32) {
    %c0_i32 = arith.constant 0 : i32
    %c0_i32_0 = arith.constant 0 : i32
    %c0_i32_1 = arith.constant 0 : i32
    return %c0_i32, %c0_i32_0 : i32, i32
  }
  func.func @transform_5(%arg0: i32) -> (i32, i32) {
    %c0_i32 = arith.constant 0 : i32
    %c0_i32_0 = arith.constant 0 : i32
    return %c0_i32, %arg0 : i32, i32
  }
}

</mosaic_0001>

<bundles_post_ra>
// kernel: mlp_forward.1
= control target key start
LH: loop header
LB: loop body
LE: loop exit
PB: predicated region body
PF: predicated region fallthrough
CT: control target
= control target key end

     0   :  { %s336_s0 = inlined_call_operand.vmem [shape: f32[8,8], index: 0, kind: input, shape index: {}]   ;;  %s337_s1 = inlined_call_operand.vmem [shape: f32[8,8], index: 1, kind: input, shape index: {}]   ;;  %s338_s2 = inlined_call_operand.vmem [shape: f32[8,1], index: 2, kind: input, shape index: {}]   ;;  %s339_s3 = inlined_call_operand.vmem [shape: f32[8,8], index: 3, kind: input, shape index: {}]   ;;  %s340_s4 = inlined_call_operand.<no memory space> [shape: f32[1,1], index: 4, kind: input, shape index: {}]   ;;  %s341_s5 = inlined_call_operand.hbm [shape: f32[1,8], index: 5, kind: output, shape index: {}]  }
   0x1   :  { %v10_v0 = vstv %s340_s4 }
   0x2   :  { %11 = vst [vmem:[#allocation2] sm:$0x1] %v10_v0 }
   0x3   :  { %v23_v1 = vld [vmem:[%s336_s0] sm:$0xff]  ;;  %vm31_vm0 = vcmask 64512   ;;  %v273_v3 = vmov 0.0   ;;  %vm274_vm1 = vmmov 0  }
   0x4   :  { %v24_v2 = vld [vmem:[%s337_s1] sm:$0xff]  ;;  %226 = vmatprep.subr.mxu0 %v273_v3  ;;  %228 = vmatprep.mubr.msk.f32.mxu0 %vm274_vm1, %v273_v3 }
   0x5   :  { %v25_v4 = vld [vmem:[%s338_s2] sm:$0xff] }
   0x6   :  { %12 = vsyncpa [#allocation4], 0  ;;  %227 = vmatpush3.msra.mxu0 %v23_v1  ;;  %v275_v5 = vmov 0   ;;  %231 = vmatprep.subr.mxu1 %v273_v3  ;;  %v111_v14 = vld [vmem:[%s339_s3] sm:$0xff]  ;;  %v191_v16 = vlaneseq  ;;  %s276_s2 = smov [#allocation3]   ;;  %vm202_vm2 = vcmask 57344  }
   0x7   :  { %240 = vset.pattern.permute.xlu0 %v275_v5  ;;  %229 = vmatmul.mubr.msk.f32.vlgmr.msra.gmra.mrb[0].mxu0 %vm31_vm0, %v24_v2  ;;  %s210_s4 = sshll.u32 %s276_s2, 4  ;;  %s211_s4 = int_to_ptr.vmem [resolvable:$true] %s210_s4 }
   0x8   :  { %28 = vperm.xlu0 %240, %v25_v4   ;;  %233 = vmatprep.mubr.msk.f32.mxu1 %vm274_vm1, %v273_v3  ;;  %v192_v17 = vshrl.u32 %v191_v16, 7  ;;  %s249_s3 = scalar_lea.vmem %s211_s4, 16  ;;  %s253_s26 = scalar_lea.vmem %s211_s4, 32 }
   0x9   :  { %v185_v6 = vld [vmem:[#allocation2] sm:$0x1]  ;;  %p250_p0 = scmp.ne.s32.totalorder %s211_s4, %s249_s3  ;;  %p254_p1 = scmp.lt.s32.totalorder %s211_s4, %s211_s4 }
   0xa   :  { %v193_v18 = vsub.s32 0, %v192_v17  ;;  %p255_p2 = scmp.lt.s32.totalorder %s253_s26, %s249_s3 }
   0xc   :  { %188 = vperm.xlu0 %240, %v185_v6   ;;  %p256_p3 = por %p255_p2, %p254_p1 }
   0xe   :  { %p257_p4 = pnand %p256_p3, %p250_p0 }
  0x87   :  { %v29_v7 = vpop.permute.xlu0 %28 }
  0x8b   :  { %v189_v19 = vpop.permute.xlu0 %188 }
  0x8c   :  { %v194_v20 = vrot.slane %v189_v19, %v193_v18 }
  0xda   :  { %v101_v8 = vpop.f32.mrb[0].mxu0 }
  0xdb   :  { %v102_v9 = vadd.f32 %v101_v8, %v29_v7  ;;  %v230_v10 = vpop.f32.mrb[1].mxu0 }
  0xdd   :  { %v219_v11 = vmul.f32 -1.442695, %v102_v9 }
  0xdf   :  { %241 = vpow2.f32 %v219_v11 }
  0xe9   :  { %v242_v12 = vpop.eup %241 }
  0xea   :  { %v108_v13 = vadd.f32 1.0, %v242_v12 }
  0xec   :  { %243 = vrcp.f32 %v108_v13 }
  0xf6   :  { %v244_v15 = vpop.eup %243 }
  0xf7   :  { %232 = vmatpush3.msra.mxu1 %v244_v15 }
  0xf8   :  { %234 = vmatmul.mubr.msk.f32.vlgmr.msra.gmra.mrb[0].mxu1 %vm31_vm0, %v111_v14 }
 0x1cb   :  { %v181_v21 = vpop.f32.mrb[0].mxu1 }
 0x1cc   :  { %v195_v22 = vadd.f32 %v194_v20, %v181_v21  ;;  %v235_v23 = vpop.f32.mrb[1].mxu1 }
 0x1ce   :  { %v221_v24 = vmul.f32 -1.442695, %v195_v22 }
 0x1d0   :  { %245 = vpow2.f32 %v221_v24 }
 0x1da   :  { %v246_v25 = vpop.eup %245 }
 0x1db   :  { %v199_v26 = vadd.f32 1.0, %v246_v25 }
 0x1dd   :  { %247 = vrcp.f32 %v199_v26 }
 0x1e7   :  { %v248_v27 = vpop.eup %247 }
 0x1e8   :  { %203 = vst.msk [vmem:[#allocation3] sm:$0x1] %vm202_vm2, %v248_v27 }
 0x1e9   :  { %260 = shalt.err (!%p257_p4)
}
 0x1ea   :  { %s261_s29 = scalar_lea.hbm %s341_s5, 16 }
 0x1eb   :  { %p262_p5 = scmp.ne.s32.totalorder %s341_s5, %s261_s29  ;;  %p265_p6 = scmp.lt.u32.totalorder %s261_s29, %s341_s5 }
 0x1ed   :  { %p267_p7 = pnand %p265_p6, %p262_p5 }
 0x1ef   :  { %270 = shalt.err (!%p267_p7)
}
 0x1f0   :  { %213 = dma.vmem_to_hbm [thread:$0]  %s211_s4, 16, %s341_s5, [#allocation4]  }
 0x1f1   :  { %271 = dma.done.wait [#allocation4], 16  }
 0x1f2   :  { %272 = vsyncadd [#allocation4], 4294967280 }
 0x1f3   :  { %217 = vsyncpa [#allocation4], 1 }

</bundles_post_ra>
